<compile_context>
chip_gen: v6e
topology: v6e:2x2x1
jax: 0.10.0
libtpu: 0.0.40
codegen_flags: <defaults>
</compile_context>

<pallas_src>
import functools

import jax
import jax.numpy as jnp
from jax.experimental import pallas as pl
from jax.experimental.pallas import tpu as pltpu


def frn_kernel(eps_ref, x_ref, tau_ref, beta_ref, gamma_ref, o_ref, *, inv_hw):
    # x_ref: (Ct, HW) block -- one batch element, a tile of channels, all of H*W.
    x = x_ref[...].astype(jnp.float32)                         # (Ct, HW)

    # nu2 = mean(x^2) over the spatial axis (fully inside the block).
    nu2 = jnp.sum(x * x, axis=-1, keepdims=True) * inv_hw      # (Ct, 1)

    # eps already abs'd in the wrapper; rsqrt goes to the EUP slot.
    scale = jax.lax.rsqrt(nu2 + eps_ref[0, 0])                 # (Ct, 1)

    # Per-channel affine then thresholded max; params are (Ct, 1) and
    # broadcast along lanes against the (Ct, HW) block.
    y = jnp.maximum(gamma_ref[...] * (x * scale) + beta_ref[...], tau_ref[...])
    o_ref[...] = y.astype(o_ref.dtype)


def filter_response_norm(x, tau, beta, gamma, eps):
    """x: (N, C, H, W); tau/beta/gamma: (1, C, 1, 1); eps: scalar."""
    N, C, H, W = x.shape
    HW = H * W

    # Lane-dense views (layout plumbing only, no compute hoisted).
    x2 = x.reshape(N, C, HW)
    tau2 = tau.reshape(C, 1).astype(jnp.float32)
    beta2 = beta.reshape(C, 1).astype(jnp.float32)
    gamma2 = gamma.reshape(C, 1).astype(jnp.float32)
    eps_smem = jnp.abs(jnp.asarray(eps, dtype=jnp.float32)).reshape(1, 1)

    # Channel tile: biggest that keeps an x block around ~1 MiB. If it tiles C,
    # it must be a multiple of 8 (sublane rule); otherwise take all channels.
    bytes_per = jnp.dtype(x.dtype).itemsize
    target_block_bytes = 1 << 20
    max_ct = max(1, target_block_bytes // (HW * bytes_per))
    if C <= 8 or max_ct >= C:
        ct = C
    else:
        ct = min(C, max(8, (max_ct // 8) * 8))
    n_ct = pl.cdiv(C, ct)

    # VMEM budget: 2x-in + 2x-out double buffers + in-kernel f32 temporaries
    # + params, clamped so it is safe on every generation (v5e/v6e/v7x).
    block_bytes = ct * HW * bytes_per
    vmem_limit = min(32 * 1024 * 1024,
                     max(4 * 1024 * 1024, 8 * block_bytes + (1 << 20)))

    kernel = functools.partial(frn_kernel, inv_hw=1.0 / float(HW))
    param_spec = pl.BlockSpec((ct, 1), lambda n, c: (c, 0))

    out2 = pl.pallas_call(
        kernel,
        out_shape=jax.ShapeDtypeStruct((N, C, HW), x.dtype),
        grid_spec=pltpu.PrefetchScalarGridSpec(
            num_scalar_prefetch=0,
            grid=(N, n_ct),
            in_specs=[
                # |eps| as a scalar in SMEM
                pl.BlockSpec((1, 1), lambda n, c: (0, 0),
                             memory_space=pltpu.MemorySpace.SMEM),
                # (batch squeezed, channel tile, full lane-dense spatial axis)
                pl.BlockSpec((None, ct, HW), lambda n, c: (n, c, 0)),
                param_spec,  # tau
                param_spec,  # beta
                param_spec,  # gamma
            ],
            out_specs=pl.BlockSpec((None, ct, HW), lambda n, c: (n, c, 0)),
        ),
        compiler_params=pltpu.CompilerParams(
            dimension_semantics=("parallel", "parallel"),
            vmem_limit_bytes=vmem_limit),
    )(eps_smem, x2, tau2, beta2, gamma2)

    return out2.reshape(N, C, H, W)


def frn_reference(x, tau, beta, gamma, eps):
    nu2 = jnp.mean(x ** 2, axis=(2, 3), keepdims=True)
    xn = x * jax.lax.rsqrt(nu2 + jnp.abs(eps))
    return jnp.maximum(gamma * xn + beta, tau)


if __name__ == "__main__":
    key = jax.random.PRNGKey(0)
    kx, kt, kb, kg = jax.random.split(key, 4)

    N, C, H, W = 2, 4, 16, 16
    x = jax.random.normal(kx, (N, C, H, W), dtype=jnp.float32)

    # Module __init__ / reset_parameters: tau=0, beta=0, gamma=1, eps=1e-6.
    # Small deterministic perturbations so the affine/max paths are exercised.
    tau = jnp.zeros((1, C, 1, 1), jnp.float32) + 0.1 * jax.random.normal(kt, (1, C, 1, 1))
    beta = jnp.zeros((1, C, 1, 1), jnp.float32) + 0.1 * jax.random.normal(kb, (1, C, 1, 1))
    gamma = jnp.ones((1, C, 1, 1), jnp.float32) + 0.1 * jax.random.normal(kg, (1, C, 1, 1))
    eps = jnp.float32(1e-6)

    out = filter_response_norm(x, tau, beta, gamma, eps)
    out = jax.block_until_ready(out)

    ref = frn_reference(x, tau, beta, gamma, eps)
    assert out.shape == (N, C, H, W)
    assert jnp.allclose(out, ref, atol=1e-5, rtol=1e-5), "mismatch vs reference"

    print("KERNEL_OK")
</pallas_src>

<mosaic_0001>
module attributes {stable_mosaic.version = 11 : i64} {
  func.func @frn_kernel(%arg0: i32, %arg1: i32, %arg2: memref<1x1xf32, #tpu.memory_space<smem>>, %arg3: memref<1x4x256xf32, #tpu.memory_space<vmem>>, %arg4: memref<4x1xf32, #tpu.memory_space<vmem>>, %arg5: memref<4x1xf32, #tpu.memory_space<vmem>>, %arg6: memref<4x1xf32, #tpu.memory_space<vmem>>, %arg7: memref<1x4x256xf32, #tpu.memory_space<vmem>>) attributes {dimension_semantics = [#tpu.dimension_semantics<parallel>, #tpu.dimension_semantics<parallel>], iteration_bounds = array<i64: 2, 1>, scalar_prefetch = 0 : i64, scratch_operands = 0 : i64, tpu.core_type = #tpu.core_type<tc>, window_params = [{transform_indices = @transform_0, window_bounds = array<i64: 1, 1>}, {transform_indices = @transform_1, window_bounds = array<i64: 1, 4, 256>}, {transform_indices = @transform_2, window_bounds = array<i64: 4, 1>}, {transform_indices = @transform_3, window_bounds = array<i64: 4, 1>}, {transform_indices = @transform_4, window_bounds = array<i64: 4, 1>}, {transform_indices = @transform_5, window_bounds = array<i64: 1, 4, 256>}]} {
    %c0 = arith.constant 0 : index
    %c0_0 = arith.constant 0 : index
    %c0_1 = arith.constant 0 : index
    %0 = vector.load %arg3[%c0, %c0_0, %c0_1] : memref<1x4x256xf32, #tpu.memory_space<vmem>>, vector<1x4x256xf32>
    %1 = vector.shape_cast %0 : vector<1x4x256xf32> to vector<4x256xf32>
    %2 = arith.mulf %1, %1 : vector<4x256xf32>
    %cst = arith.constant dense<0.000000e+00> : vector<4xf32>
    %3 = vector.multi_reduction <add>, %2, %cst [1] : vector<4x256xf32> to vector<4xf32>
    %4 = vector.shape_cast %3 : vector<4xf32> to vector<4x1xf32>
    %cst_2 = arith.constant 3.906250e-03 : f32
    %5 = vector.broadcast %cst_2 : f32 to vector<4x1xf32>
    %6 = arith.mulf %4, %5 : vector<4x1xf32>
    %c0_3 = arith.constant 0 : index
    %c0_4 = arith.constant 0 : index
    %7 = memref.load %arg2[%c0_3, %c0_4] : memref<1x1xf32, #tpu.memory_space<smem>>
    %8 = vector.broadcast %7 : f32 to vector<4x1xf32>
    %9 = arith.addf %6, %8 : vector<4x1xf32>
    %10 = math.rsqrt %9 : vector<4x1xf32>
    %c0_5 = arith.constant 0 : index
    %c0_6 = arith.constant 0 : index
    %11 = vector.load %arg6[%c0_5, %c0_6] : memref<4x1xf32, #tpu.memory_space<vmem>>, vector<4x1xf32>
    %12 = vector.broadcast %10 : vector<4x1xf32> to vector<4x256xf32>
    %13 = arith.mulf %1, %12 : vector<4x256xf32>
    %14 = vector.broadcast %11 : vector<4x1xf32> to vector<4x256xf32>
    %15 = arith.mulf %14, %13 : vector<4x256xf32>
    %c0_7 = arith.constant 0 : index
    %c0_8 = arith.constant 0 : index
    %16 = vector.load %arg5[%c0_7, %c0_8] : memref<4x1xf32, #tpu.memory_space<vmem>>, vector<4x1xf32>
    %17 = vector.broadcast %16 : vector<4x1xf32> to vector<4x256xf32>
    %18 = arith.addf %15, %17 : vector<4x256xf32>
    %c0_9 = arith.constant 0 : index
    %c0_10 = arith.constant 0 : index
    %19 = vector.load %arg4[%c0_9, %c0_10] : memref<4x1xf32, #tpu.memory_space<vmem>>, vector<4x1xf32>
    %20 = vector.broadcast %19 : vector<4x1xf32> to vector<4x256xf32>
    %21 = arith.maximumf %18, %20 : vector<4x256xf32>
    %c0_11 = arith.constant 0 : index
    %c0_12 = arith.constant 0 : index
    %c0_13 = arith.constant 0 : index
    %22 = vector.load %arg7[%c0_11, %c0_12, %c0_13] : memref<1x4x256xf32, #tpu.memory_space<vmem>>, vector<1x4x256xf32>
    %23 = vector.shape_cast %22 : vector<1x4x256xf32> to vector<4x256xf32>
    %24 = vector.shape_cast %21 : vector<4x256xf32> to vector<1x4x256xf32>
    tpu.vector_store %arg7[%c0_11, %c0_12, %c0_13], %24 {strides = array<i32>} : memref<1x4x256xf32, #tpu.memory_space<vmem>>, vector<1x4x256xf32>,
    return
  }
  func.func @transform_0(%arg0: i32, %arg1: i32) -> (i32, i32) {
    %c0_i32 = arith.constant 0 : i32
    %c0_i32_0 = arith.constant 0 : i32
    %c0_i32_1 = arith.constant 0 : i32
    return %c0_i32, %c0_i32_0 : i32, i32
  }
  func.func @transform_1(%arg0: i32, %arg1: i32) -> (i32, i32, i32) {
    %c0_i32 = arith.constant 0 : i32
    %c0_i32_0 = arith.constant 0 : i32
    return %arg0, %arg1, %c0_i32 : i32, i32, i32
  }
  func.func @transform_2(%arg0: i32, %arg1: i32) -> (i32, i32) {
    %c0_i32 = arith.constant 0 : i32
    %c0_i32_0 = arith.constant 0 : i32
    return %arg1, %c0_i32 : i32, i32
  }
  func.func @transform_3(%arg0: i32, %arg1: i32) -> (i32, i32) {
    %c0_i32 = arith.constant 0 : i32
    %c0_i32_0 = arith.constant 0 : i32
    return %arg1, %c0_i32 : i32, i32
  }
  func.func @transform_4(%arg0: i32, %arg1: i32) -> (i32, i32) {
    %c0_i32 = arith.constant 0 : i32
    %c0_i32_0 = arith.constant 0 : i32
    return %arg1, %c0_i32 : i32, i32
  }
  func.func @transform_5(%arg0: i32, %arg1: i32) -> (i32, i32, i32) {
    %c0_i32 = arith.constant 0 : i32
    %c0_i32_0 = arith.constant 0 : i32
    return %arg0, %arg1, %c0_i32 : i32, i32, i32
  }
}

</mosaic_0001>

<bundles_post_ra>
// kernel: tpu_custom_call.1
= control target key start
LH: loop header
LB: loop body
LE: loop exit
PB: predicated region body
PF: predicated region fallthrough
CT: control target
= control target key end

     0   :  { %s803_s0 = inlined_call_operand.<no memory space> [shape: f32[1,1], index: 0, kind: input, shape index: {}]   ;;  %s804_s1 = inlined_call_operand.vmem [shape: f32[2,4,256], index: 1, kind: input, shape index: {}]   ;;  %s805_s2 = inlined_call_operand.vmem [shape: f32[4,1], index: 2, kind: input, shape index: {}]   ;;  %s806_s3 = inlined_call_operand.vmem [shape: f32[4,1], index: 3, kind: input, shape index: {}]   ;;  %s807_s4 = inlined_call_operand.vmem [shape: f32[4,1], index: 4, kind: input, shape index: {}]   ;;  %s808_s5 = inlined_call_operand.hbm [shape: f32[2,4,256], index: 5, kind: output, shape index: {}]  }
   0x1   :  { %10 = sst [smem:[#allocation2]] %s803_s0 }
   0x2   :  { %11 = vsyncpa [#allocation4], 0 }
   0x3   :  { %13 = vsyncpa [#allocation4 + $0x1], 0  ;;  %s695_s20 = smov 0   ;;  %s697_s21 = smov 0  }
   0x4   :  { %s699_s22 = smov 0   ;;  %s701_s23 = smov 0  }
   0x5   :  { %s703_s24 = smov 0   ;;  %s705_s25 = smov 0  }
   0x6 LB: > { %s502_s0 = sadd.s32 4294967295, %s657_s25   ;;  %s503_s26 = sadd.s32 4294967294, %s657_s25   ;;  %s657_s25 = sphi %s705_s25, %s19_s25   ;;  %s653_s24 = sphi %s703_s24, %s815_s24   ;;  %s649_s23 = sphi %s701_s23, %s814_s23   ;;  %s645_s22 = sphi %s699_s22, %s813_s22   ;;  %s641_s21 = sphi %s697_s21, %s812_s21   ;;  %s637_s20 = sphi %s695_s20, %s811_s20  }
   0x7   : > { %s31_s27 = sadd.s32 1, %s653_s24  ;;  %s167_s28 = sadd.s32 1, %s645_s22 }
   0x8   : > { %p33_p0 = scmp.ge.s32.totalorder %s31_s27, 2  ;;  %p177_p1 = scmp.ne.s32.totalorder %s645_s22, %s641_s21 }
   0x9   : > { %p178_p2 = scmp.eq.s32.totalorder %s502_s0, 1  ;;  %p183_p3 = scmp.ne.s32.totalorder %s641_s21, %s637_s20 }
   0xa   : > { %s817_s27 = smov (%p33_p0, %s31_s27), 0  ;;  %p184_p5 = scmp.eq.s32.totalorder %s503_s26, 1 }
   0xb   : > { %p735_p4 = por %p178_p2, %p177_p1  ;;  %s162_s30 = ssub.s32 %s653_s24, %s817_s27 }
   0xc   : > { %p509_p6 = scmp.ge.s32.totalorder %s657_s25, 1  ;;  %p165_p7 = scmp.eq.s32.totalorder %s162_s30, 0 }
   0xd   : > { %p742_p8 = por %p184_p5, %p183_p3  ;;  %p238_p9 = scmp.lt.s32.totalorder %s657_s25, 3 }
   0xe   : > { %s748_s7 = scalar_select %p165_p7, %s645_s22, %s167_s28  }
   0xf   : > { %p239_p10 = pnand %p509_p6, %p238_p9 }
  0x10   : > { %p282_p11 = scmp.lt.s32.totalorder (!%p239_p10), %s649_s23, 1  ;;  %s315_s19 = sld [smem:[#allocation2]] (!%p239_p10) }
  0x11   : > { %242 = sbr.rel (%p239_p10) target bundleno = 217 (0xd9), region = 40  ;;  %s279_s0 = sand.u32 (!%p239_p10), 1, %s641_s21  }
  0x12   : > { %s510_s26 = sshll.u32 (!%p239_p10), %s279_s0, 3  ;;  %s519_s28 = sshll.u32 (!%p239_p10), %s649_s23, 7 }
  0x13   : > { %s281_s30 = scalar_lea.vmem (!%p239_p10), [#allocation3], %s510_s26  ;;  %s376_s11 = scalar_lea.hbm (!%p239_p10), %s808_s5, %s519_s28 }
  0x14   : > { %s378_s8 = sshll.u32 (!%p239_p10), %s281_s30, 4  ;;  %s362_s12 = scalar_lea.sflag (!%p239_p10), [#allocation4], %s279_s0  ;;  %s379_s8 = int_to_ptr.vmem [resolvable:$true] %s378_s8 }
  0x15   : > { %s661_s14 = smov (!%p239_p10), [#allocation3]  }
  0x16   : > { %v340_v0 = vld [vmem:[%s806_s3] sm:$0xf]  ;;  %v659_v1 = vmov 0   ;;  %s283_s10 = scalar_select %p282_p11, %s649_s23, 1  ;;  %vm308_vm0 = vcmask 1043456   ;;  %v316_v10 = vstv %s315_s19  ;;  %v324_v16 = vlaneseq }
  0x17   : > { %578 = vset.pattern.permute.xlu1 %v659_v1  ;;  %577 = vset.pattern.permute.xlu0 %v659_v1  ;;  %v348_v2 = vld [vmem:[%s805_s2] sm:$0xf]  ;;  %v660_v14 = vmov 839922192   ;;  %s585_s15 = sshll.u32 %s661_s14, 4  ;;  %s586_s15 = int_to_ptr.vmem [resolvable:$false] %s585_s15 }
  0x18   : > { %343 = vperm.xlu1 %578, %v340_v0   ;;  %s518_s13 = sshll.u32 %s283_s10, 3  ;;  %v319_v9 = vld [vmem:[%s807_s4] sm:$0xf]  ;;  %v322_v15 = vunpack.c.l.s4 %v660_v14  ;;  %v325_v18 = vshrl.u32 %v324_v16, 7  ;;  %s587_s23 = scalar_lea.vmem %s586_s15, 256 }
  0x19   : > { %s290_s16 = scalar_lea.vmem %s804_s1, %s518_s13  ;;  %s581_s13 = scalar_lea.vmem %s379_s8, 128 }
  0x1a   : > { %v303_v3 = vld [vmem:[%s290_s16] sm:$0xff]  ;;  %v323_v17 = vunpack.c.0.s8 %v322_v15  ;;  %p582_p12 = scmp.ne.s32.totalorder %s379_s8, %s581_s13  ;;  %p588_p1 = scmp.lt.s32.totalorder %s379_s8, %s586_s15 }
  0x1b   : > { %v304_v4 = vmul.f32 %v303_v3, %v303_v3  ;;  %p589_p2 = scmp.lt.s32.totalorder %s587_s23, %s581_s13 }
  0x1c   : > { %351 = vperm.xlu1 %578, %v348_v2   ;;  %v326_v19 = vsub.s32 %v323_v17, %v325_v18  ;;  %p583_p13 = pnand %p582_p12, %p735_p4 }
  0x1d   : > { %v306_v5 = vcombine.high %v304_v4, %v304_v4  ;;  %v309_v6 = vsel %vm308_vm0, %v304_v4, 0.0  ;;  %p590_p3 = por %p589_p2, %p588_p1 }
  0x1e   : > { %p584_p0 = pneg %p583_p13 }
  0x1f   : > { %v310_v7 = vsel %vm308_vm0, %v306_v5, 0.0 }
  0x20   : > { %v311_v8 = vadd.f32 %v310_v7, %v309_v6  ;;  %p591_p5 = pnand %p590_p3, %p584_p0 }
  0x22   : > { %312 = vadd.xlane.f32.xlu0 %v311_v8 }
  0x38   : > { %332 = vperm.xlu0 %577, %v319_v9  }
  0x93   : > { %v344_v24 = vpop.permute.xlu1 %343 }
  0x97   : > { %v352_v30 = vpop.permute.xlu1 %351 }
  0xab   : > { %v313_v11 = vpop.xlane.xlu0 %312 }
  0xac   : > { %v314_v12 = vmul.f32 0.00390625, %v313_v11 }
  0xae   : > { %v317_v13 = vadd.f32 %v316_v10, %v314_v12 }
  0xb0   : > { %579 = vrsqrt.f32 %v317_v13 }
  0xb3   : > { %v333_v22 = vpop.permute.xlu0 %332 }
  0xbd   : > { %v580_v20 = vpop.eup %579 }
  0xbe   : > { %v327_v21 = vrot.slane %v580_v20, %v326_v19 }
  0xc0   : > { %v329_v23 = vmul.f32 %v327_v21, %v303_v3 }
  0xc2   : > { %v336_v25 = vcombine.high %v329_v23, %v329_v23  ;;  %v338_v26 = vmul.f32 %v333_v22, %v329_v23 }
  0xc4   : > { %v339_v27 = vmul.f32 %v336_v25, %v333_v22  ;;  %v346_v28 = vadd.f32 %v344_v24, %v338_v26 }
  0xc6   : > { %v347_v29 = vadd.f32 %v344_v24, %v339_v27  ;;  %v354_v31 = vmax.f32 %v346_v28, %v352_v30 }
  0xc8   : > { %v355_v32 = vmax.f32 %v347_v29, %v352_v30 }
  0xca   : > { %v358_v33 = vcombine.low %v354_v31, %v355_v32 }
  0xcc   : > { %360 = vst [vmem:[%s281_s30] sm:$0xff] %v358_v33 }
  0xcd   : > { %594 = shalt.err (!%p591_p5)
}
  0xce   : > { %s595_s16 = scalar_lea.hbm %s376_s11, 128  ;;  %s599_s19 = scalar_lea.hbm %s808_s5, 256 }
  0xcf   : > { %p596_p6 = scmp.ne.s32.totalorder %s376_s11, %s595_s16  ;;  %p600_p10 = scmp.lt.s32.totalorder %s376_s11, %s808_s5 }
  0xd0   : > { %p601_p11 = scmp.lt.s32.totalorder %s599_s19, %s595_s16 }
  0xd1   : > { %p597_p7 = pnand %p596_p6, %p735_p4 }
  0xd2   : > { %p602_p12 = por %p601_p11, %p600_p10 }
  0xd3   : > { %p598_p9 = pneg %p597_p7 }
  0xd5   : > { %p603_p13 = pnand %p602_p12, %p598_p9 }
  0xd7   : > { %606 = shalt.err (!%p603_p13)
}
  0xd8   : > { %520 = dma.vmem_to_hbm [thread:$0]  (%p735_p4), %s379_s8, 128, %s376_s11, %s362_s12  }
  0xd9 PF: > { %p526_p0 = scmp.ge.s32.totalorder %s657_s25, 2  ;;  %s390_s28 = sand.u32 1, %s637_s20  }
  0xda   : > { %s391_s30 = scalar_lea.sflag [#allocation4], %s390_s28 }
  0xdb   : > { %p523_p1 = pnand %p526_p0, %p742_p8 }
  0xdd   : > { %p524_p2 = pneg %p523_p1 }
  0xdf   : > { %632 = dma.done.wait (%p524_p2), %s391_s30, 128  }
  0xe0   : > { %634 = vsyncadd (%p524_p2), %s391_s30, 4294967168  ;;  %s19_s25 = sadd.s32 1, %s657_s25   ;;  %s811_s20 = smov %s641_s21 }
  0xe1   : > { %p16_p3 = scmp.ge.s32.totalorder %s19_s25, 4   ;;  %s812_s21 = smov %s645_s22 }
  0xe2   : > { %s813_s22 = smov %s748_s7  ;;  %s814_s23 = smov %s653_s24 }
  0xe3   : > { %s815_s24 = smov %s817_s27  ;;  %18 = sbr.rel (!%p16_p3) target bundleno = 6 (0x6), region = 84 }
  0xe8   :  { %396 = vsyncpa [#allocation4], 1 }
  0xe9   :  { %398 = vsyncpa [#allocation4 + $0x1], 1 }

</bundles_post_ra>
